<compile_context>
chip_gen: v5e
topology: v5e:2x2
jax: 0.10.0
libtpu: 0.0.40
codegen_flags: <defaults>
</compile_context>

<pallas_src>
import jax
import jax.numpy as jnp
from jax.experimental import pallas as pl
from jax.experimental.pallas import tpu as pltpu


def _round_up(n, m):
    return ((n + m - 1) // m) * m


def _mlp_kernel(x_ref, w1_ref, b1_ref, w2_ref, b2_ref, w3_ref, b3_ref, o_ref):
    hi = jax.lax.Precision.HIGHEST
    # fc1 + ReLU  (f32 MXU, f32 accumulate)
    h1 = jnp.dot(x_ref[...], w1_ref[...],
                 preferred_element_type=jnp.float32, precision=hi)
    h1 = jnp.maximum(h1 + b1_ref[...], 0.0)
    # fc2 + ReLU
    h2 = jnp.dot(h1, w2_ref[...],
                 preferred_element_type=jnp.float32, precision=hi)
    h2 = jnp.maximum(h2 + b2_ref[...], 0.0)
    # fc3 (logits) — output block is exactly (tb, num_classes): only useful
    # bytes ever reach HBM.
    logits = jnp.dot(h2, w3_ref[...],
                     preferred_element_type=jnp.float32, precision=hi)
    o_ref[...] = (logits + b3_ref[...]).astype(o_ref.dtype)


def crop_classifier_forward(x, params, *, max_batch_tile=4096):
    """x: (batch, input_size) float32. params: dict of w1,b1,w2,b2,w3,b3.

    Weights are (in, out); biases are (1, out). Returns (batch, num_classes) f32.
    """
    w1 = params["w1"].astype(jnp.float32)
    b1 = params["b1"].astype(jnp.float32)
    w2 = params["w2"].astype(jnp.float32)
    b2 = params["b2"].astype(jnp.float32)
    w3 = params["w3"].astype(jnp.float32)
    b3 = params["b3"].astype(jnp.float32)

    batch, input_size = x.shape
    hidden1 = w1.shape[1]
    hidden2 = w2.shape[1]
    num_classes = w3.shape[1]

    # --- batch tiling ---------------------------------------------------------
    # >=2 grid steps when there is enough work (so v7x's two TensorCores both
    # get a share of the "parallel" axis); tile size chosen to (nearly) divide
    # the 8-row-rounded batch so over-padding stays minimal.
    rows = _round_up(batch, 8)
    num_tiles = max(pl.cdiv(rows, max_batch_tile), 2 if rows >= 16 else 1)
    tb = _round_up(pl.cdiv(rows, num_tiles), 8)
    num_tiles = pl.cdiv(rows, tb)
    padded_batch = num_tiles * tb

    # Only the batch dim is (possibly) padded; no feature padding, no dtype cast,
    # so there is no extra full read+write pass over x before the kernel.
    x = x.astype(jnp.float32)
    if padded_batch != batch:
        x = jnp.pad(x, ((0, padded_batch - batch), (0, 0)))

    # --- VMEM budget (per tile, lane-padded to 128-wide f32 rows) -------------
    lane_row_bytes = 128 * 4
    # x (double-buffered) + out (double-buffered) + h1/h2/logits temporaries.
    vmem_tile_bytes = 7 * tb * lane_row_bytes
    vmem_limit = int(min(max(vmem_tile_bytes * 3 // 2 + (2 << 20), 16 << 20),
                         56 << 20))

    # --- advisory cost estimate (narrow output, unpadded x) -------------------
    flops = 2 * padded_batch * (input_size * hidden1
                                + hidden1 * hidden2
                                + hidden2 * num_classes)
    param_bytes = 4 * (w1.size + b1.size + w2.size + b2.size + w3.size + b3.size)
    bytes_accessed = (padded_batch * input_size * 4      # x read
                      + param_bytes                       # weights/biases
                      + padded_batch * num_classes * 4)   # logits write

    # constant index_map -> operand DMA'd once, stays resident across the grid
    full = lambda a: pl.BlockSpec(a.shape, lambda i: (0,) * a.ndim)

    out = pl.pallas_call(
        _mlp_kernel,
        out_shape=jax.ShapeDtypeStruct((padded_batch, num_classes), jnp.float32),
        grid=(num_tiles,),
        in_specs=[pl.BlockSpec((tb, input_size), lambda i: (i, 0)),  # x: tiled
                  full(w1), full(b1),
                  full(w2), full(b2),
                  full(w3), full(b3)],
        out_specs=pl.BlockSpec((tb, num_classes), lambda i: (i, 0)),
        compiler_params=pltpu.CompilerParams(
            dimension_semantics=("parallel",),
            vmem_limit_bytes=vmem_limit),
        cost_estimate=pl.CostEstimate(flops=flops, transcendentals=0,
                                      bytes_accessed=bytes_accessed),
    )(x, w1, b1, w2, b2, w3, b3)

    return out[:batch] if padded_batch != batch else out


def init_params(key, input_size, num_classes):
    """Deterministic synthetic init (uniform, PyTorch-Linear-like bounds)."""
    ks = jax.random.split(key, 6)

    def linear(kw, kb, fan_in, fan_out):
        bound = 1.0 / jnp.sqrt(fan_in)
        w = jax.random.uniform(kw, (fan_in, fan_out), jnp.float32, -bound, bound)
        b = jax.random.uniform(kb, (1, fan_out), jnp.float32, -bound, bound)
        return w, b

    w1, b1 = linear(ks[0], ks[1], input_size, 32)
    w2, b2 = linear(ks[2], ks[3], 32, 16)
    w3, b3 = linear(ks[4], ks[5], 16, num_classes)
    return dict(w1=w1, b1=b1, w2=w2, b2=b2, w3=w3, b3=b3)


def _reference(x, p):
    hi = jax.lax.Precision.HIGHEST
    h = jnp.maximum(jnp.dot(x, p["w1"], precision=hi) + p["b1"], 0.0)
    h = jnp.maximum(jnp.dot(h, p["w2"], precision=hi) + p["b2"], 0.0)
    return jnp.dot(h, p["w3"], precision=hi) + p["b3"]


if __name__ == "__main__":
    key = jax.random.PRNGKey(0)
    k_x, k_p = jax.random.split(key)

    batch = 8
    input_size = 7      # N, P, K, temperature, humidity, pH, rainfall
    num_classes = 8     # demo value; real value comes from the label encoder

    x = jax.random.normal(k_x, (batch, input_size), jnp.float32)
    params = init_params(k_p, input_size, num_classes)

    out = crop_classifier_forward(x, params)
    out = jax.block_until_ready(out)

    ref = _reference(x, params)
    assert out.shape == (batch, num_classes)
    assert jnp.allclose(out, ref, atol=2e-3, rtol=2e-3), (
        float(jnp.max(jnp.abs(out - ref))))
    print("KERNEL_OK")
</pallas_src>

<mosaic_0001>
module attributes {stable_mosaic.version = 11 : i64} {
  func.func @_mlp_kernel(%arg0: i32, %arg1: memref<8x7xf32, #tpu.memory_space<vmem>>, %arg2: memref<7x32xf32, #tpu.memory_space<vmem>>, %arg3: memref<1x32xf32, #tpu.memory_space<vmem>>, %arg4: memref<32x16xf32, #tpu.memory_space<vmem>>, %arg5: memref<1x16xf32, #tpu.memory_space<vmem>>, %arg6: memref<16x8xf32, #tpu.memory_space<vmem>>, %arg7: memref<1x8xf32, #tpu.memory_space<vmem>>, %arg8: memref<8x8xf32, #tpu.memory_space<vmem>>) attributes {dimension_semantics = [#tpu.dimension_semantics<parallel>], iteration_bounds = array<i64: 1>, scalar_prefetch = 0 : i64, scratch_operands = 0 : i64, tpu.core_type = #tpu.core_type<tc>, window_params = [{transform_indices = @transform_0, window_bounds = array<i64: 8, 7>}, {pipeline_mode = #tpu.pipeline_mode<synchronous>, transform_indices = @transform_1, window_bounds = array<i64: 7, 32>}, {pipeline_mode = #tpu.pipeline_mode<synchronous>, transform_indices = @transform_2, window_bounds = array<i64: 1, 32>}, {pipeline_mode = #tpu.pipeline_mode<synchronous>, transform_indices = @transform_3, window_bounds = array<i64: 32, 16>}, {pipeline_mode = #tpu.pipeline_mode<synchronous>, transform_indices = @transform_4, window_bounds = array<i64: 1, 16>}, {pipeline_mode = #tpu.pipeline_mode<synchronous>, transform_indices = @transform_5, window_bounds = array<i64: 16, 8>}, {pipeline_mode = #tpu.pipeline_mode<synchronous>, transform_indices = @transform_6, window_bounds = array<i64: 1, 8>}, {transform_indices = @transform_7, window_bounds = array<i64: 8, 8>}]} {
    %c0 = arith.constant 0 : index
    %c0_0 = arith.constant 0 : index
    %0 = vector.load %arg1[%c0, %c0_0] : memref<8x7xf32, #tpu.memory_space<vmem>>, vector<8x7xf32>
    %c0_1 = arith.constant 0 : index
    %c0_2 = arith.constant 0 : index
    %1 = vector.load %arg2[%c0_1, %c0_2] : memref<7x32xf32, #tpu.memory_space<vmem>>, vector<7x32xf32>
    %cst = arith.constant dense<0.000000e+00> : vector<8x32xf32>
    %2 = tpu.matmul %0, %1, %cst {dimension_numbers = #tpu.dot_dimension_numbers<[1], [0], [0], [1], [0, 0, 1, 1], [], []>, precision = #tpu.contract_precision<fp32>} : vector<8x7xf32>, vector<7x32xf32>, vector<8x32xf32> -> vector<8x32xf32>
    %c0_3 = arith.constant 0 : index
    %c0_4 = arith.constant 0 : index
    %3 = vector.load %arg3[%c0_3, %c0_4] : memref<1x32xf32, #tpu.memory_space<vmem>>, vector<1x32xf32>
    %4 = vector.broadcast %3 : vector<1x32xf32> to vector<8x32xf32>
    %5 = arith.addf %2, %4 : vector<8x32xf32>
    %cst_5 = arith.constant 0.000000e+00 : f32
    %6 = vector.broadcast %cst_5 : f32 to vector<8x32xf32>
    %7 = arith.maximumf %5, %6 : vector<8x32xf32>
    %c0_6 = arith.constant 0 : index
    %c0_7 = arith.constant 0 : index
    %8 = vector.load %arg4[%c0_6, %c0_7] : memref<32x16xf32, #tpu.memory_space<vmem>>, vector<32x16xf32>
    %cst_8 = arith.constant dense<0.000000e+00> : vector<8x16xf32>
    %9 = tpu.matmul %7, %8, %cst_8 {dimension_numbers = #tpu.dot_dimension_numbers<[1], [0], [0], [1], [0, 0, 1, 1], [], []>, precision = #tpu.contract_precision<fp32>} : vector<8x32xf32>, vector<32x16xf32>, vector<8x16xf32> -> vector<8x16xf32>
    %c0_9 = arith.constant 0 : index
    %c0_10 = arith.constant 0 : index
    %10 = vector.load %arg5[%c0_9, %c0_10] : memref<1x16xf32, #tpu.memory_space<vmem>>, vector<1x16xf32>
    %11 = vector.broadcast %10 : vector<1x16xf32> to vector<8x16xf32>
    %12 = arith.addf %9, %11 : vector<8x16xf32>
    %cst_11 = arith.constant 0.000000e+00 : f32
    %13 = vector.broadcast %cst_11 : f32 to vector<8x16xf32>
    %14 = arith.maximumf %12, %13 : vector<8x16xf32>
    %c0_12 = arith.constant 0 : index
    %c0_13 = arith.constant 0 : index
    %15 = vector.load %arg6[%c0_12, %c0_13] : memref<16x8xf32, #tpu.memory_space<vmem>>, vector<16x8xf32>
    %cst_14 = arith.constant dense<0.000000e+00> : vector<8x8xf32>
    %16 = tpu.matmul %14, %15, %cst_14 {dimension_numbers = #tpu.dot_dimension_numbers<[1], [0], [0], [1], [0, 0, 1, 1], [], []>, precision = #tpu.contract_precision<fp32>} : vector<8x16xf32>, vector<16x8xf32>, vector<8x8xf32> -> vector<8x8xf32>
    %c0_15 = arith.constant 0 : index
    %c0_16 = arith.constant 0 : index
    %17 = vector.load %arg7[%c0_15, %c0_16] : memref<1x8xf32, #tpu.memory_space<vmem>>, vector<1x8xf32>
    %18 = vector.broadcast %17 : vector<1x8xf32> to vector<8x8xf32>
    %19 = arith.addf %16, %18 : vector<8x8xf32>
    %c0_17 = arith.constant 0 : index
    %c0_18 = arith.constant 0 : index
    %20 = vector.load %arg8[%c0_17, %c0_18] : memref<8x8xf32, #tpu.memory_space<vmem>>, vector<8x8xf32>
    tpu.vector_store %arg8[%c0_17, %c0_18], %19 {strides = array<i32>} : memref<8x8xf32, #tpu.memory_space<vmem>>, vector<8x8xf32>,
    return
  }
  func.func @transform_0(%arg0: i32) -> (i32, i32) {
    %c0_i32 = arith.constant 0 : i32
    %c0_i32_0 = arith.constant 0 : i32
    return %arg0, %c0_i32 : i32, i32
  }
  func.func @transform_1(%arg0: i32) -> (i32, i32) {
    %c0_i32 = arith.constant 0 : i32
    %c0_i32_0 = arith.constant 0 : i32
    %c0_i32_1 = arith.constant 0 : i32
    return %c0_i32, %c0_i32_0 : i32, i32
  }
  func.func @transform_2(%arg0: i32) -> (i32, i32) {
    %c0_i32 = arith.constant 0 : i32
    %c0_i32_0 = arith.constant 0 : i32
    %c0_i32_1 = arith.constant 0 : i32
    return %c0_i32, %c0_i32_0 : i32, i32
  }
  func.func @transform_3(%arg0: i32) -> (i32, i32) {
    %c0_i32 = arith.constant 0 : i32
    %c0_i32_0 = arith.constant 0 : i32
    %c0_i32_1 = arith.constant 0 : i32
    return %c0_i32, %c0_i32_0 : i32, i32
  }
  func.func @transform_4(%arg0: i32) -> (i32, i32) {
    %c0_i32 = arith.constant 0 : i32
    %c0_i32_0 = arith.constant 0 : i32
    %c0_i32_1 = arith.constant 0 : i32
    return %c0_i32, %c0_i32_0 : i32, i32
  }
  func.func @transform_5(%arg0: i32) -> (i32, i32) {
    %c0_i32 = arith.constant 0 : i32
    %c0_i32_0 = arith.constant 0 : i32
    %c0_i32_1 = arith.constant 0 : i32
    return %c0_i32, %c0_i32_0 : i32, i32
  }
  func.func @transform_6(%arg0: i32) -> (i32, i32) {
    %c0_i32 = arith.constant 0 : i32
    %c0_i32_0 = arith.constant 0 : i32
    %c0_i32_1 = arith.constant 0 : i32
    return %c0_i32, %c0_i32_0 : i32, i32
  }
  func.func @transform_7(%arg0: i32) -> (i32, i32) {
    %c0_i32 = arith.constant 0 : i32
    %c0_i32_0 = arith.constant 0 : i32
    return %arg0, %c0_i32 : i32, i32
  }
}

</mosaic_0001>

<bundles_post_ra>
// kernel: tpu_custom_call.1
= control target key start
LH: loop header
LB: loop body
LE: loop exit
PB: predicated region body
PF: predicated region fallthrough
CT: control target
= control target key end

     0   :  { %vm37_vm0 = vcmask 1046528   ;;  %vm33_vm1 = vcmask 56320   ;;  %s680_s0 = inlined_call_operand.vmem [shape: f32[8,7], index: 0, kind: input, shape index: {}]   ;;  %s681_s1 = inlined_call_operand.vmem [shape: f32[7,32], index: 1, kind: input, shape index: {}]   ;;  %s682_s2 = inlined_call_operand.vmem [shape: f32[1,32], index: 2, kind: input, shape index: {}]   ;;  %s683_s3 = inlined_call_operand.vmem [shape: f32[32,16], index: 3, kind: input, shape index: {}]   ;;  %s684_s4 = inlined_call_operand.vmem [shape: f32[1,16], index: 4, kind: input, shape index: {}]   ;;  %s685_s5 = inlined_call_operand.vmem [shape: f32[16,8], index: 5, kind: input, shape index: {}]   ;;  %s686_s6 = inlined_call_operand.vmem [shape: f32[1,8], index: 6, kind: input, shape index: {}]   ;;  %s687_s7 = inlined_call_operand.hbm [shape: f32[8,8], index: 7, kind: output, shape index: {}]  }
   0x1   :  { %v28_v0 = vld [vmem:[%s681_s1] sm:$0x7f] }
   0x2   :  { %v27_v1 = vld [vmem:[%s680_s0] sm:$0xff]  ;;  %v39_v2 = vsel %vm37_vm0, %v28_v0, 0 }
   0x3   :  { %v35_v3 = vsel %vm33_vm1, %v27_v1, 0  ;;  %v56_v4 = vand.u32 4294901760, %v39_v2 }
   0x4   :  { %v58_v5 = vand.u32 4294901760, %v35_v3 }
   0x5   :  { %12 = vsyncpa [#allocation3], 0  ;;  %v83_v6 = vsub.f32 %v39_v2, %v56_v4  ;;  %57 = vmatpush.msra.mxu0 %v56_v4  ;;  %133 = vmatpush.msra.mxu3 %v56_v4  ;;  %v191_v14 = vld [vmem:[%s683_s3 + $0x18] sm:$0xff]  ;;  %v190_v16 = vld [vmem:[%s683_s3 + $0x10] sm:$0xff]  ;;  %vm196_vm2 = vcmask 261120   ;;  %vm392_vm3 = vcmask 130048  }
   0x6   :  { %v59_v7 = vsub.f32 %v35_v3, %v58_v5  ;;  %v212_v15 = vand.u32 4294901760, %v191_v14  ;;  %v214_v18 = vand.u32 4294901760, %v190_v16  ;;  %v189_v19 = vld [vmem:[%s683_s3 + $0x8] sm:$0xff]  ;;  %v188_v23 = vld [vmem:[%s683_s3] sm:$0xff]  ;;  %s603_s17 = smov [#allocation2]   ;;  %s564_s21 = sshll.u32 %s687_s7, 4  ;;  %s565_s21 = int_to_ptr.hbm [resolvable:$true] %s564_s21 }
   0x7   :  { %110 = vmatpush.msra.mxu2 %v83_v6  ;;  %v84_v9 = vand.u32 4294901760, %v83_v6  ;;  %v216_v22 = vand.u32 4294901760, %v189_v19  ;;  %v218_v27 = vand.u32 4294901760, %v188_v23  ;;  %v574_v38 = vld [vmem:[%s682_s2] ss:$0 sm:$0xff]  ;;  %v387_v58 = vld [vmem:[%s685_s5 + $0x8] sm:$0xff] }
   0x8   :  { %v60_v8 = vand.u32 4294901760, %v59_v7  ;;  %113 = vmatmul.f32.vlgmr.msra.gmra.mxu2 %v59_v7  ;;  %v242_v17 = vsub.f32 %v191_v14, %v212_v15  ;;  %v248_v21 = vsub.f32 %v190_v16, %v214_v18  ;;  %v410_v59 = vand.u32 4294901760, %v387_v58  ;;  %v386_v60 = vld [vmem:[%s685_s5] sm:$0xff]  ;;  %s562_s18 = sshll.u32 %s603_s17, 4  ;;  %s563_s18 = int_to_ptr.vmem [resolvable:$true] %s562_s18 }
   0x9   :  { %159 = vmatpush.msrb.mxu0 %v84_v9  ;;  %v85_v11 = vsub.f32 %v83_v6, %v84_v9  ;;  %213 = vmatpush.msrb.mxu2 %v212_v15  ;;  %v254_v26 = vsub.f32 %v189_v19, %v216_v22  ;;  %v260_v31 = vsub.f32 %v188_v23, %v218_v27  ;;  %v412_v62 = vand.u32 4294901760, %v386_v60  ;;  %v575_v6 = vld [vmem:[%s684_s4] ss:$0 sm:$0xff] }
   0xa   :  { %v61_v10 = vsub.f32 %v59_v7, %v60_v8  ;;  %137 = vmatmul.f32.vlgmr.msra.gmra.mxu3 %v60_v8  ;;  %v243_v20 = vand.u32 4294901760, %v242_v17  ;;  %v249_v25 = vand.u32 4294901760, %v248_v21  ;;  %v438_v61 = vsub.f32 %v387_v58, %v410_v59 }
   0xb   :  { %v86_v13 = vand.u32 4294901760, %v85_v11  ;;  %215 = vmatpush.msrb.mxu2 %v214_v18  ;;  %v255_v30 = vand.u32 4294901760, %v254_v26  ;;  %v261_v34 = vand.u32 4294901760, %v260_v31  ;;  %v444_v0 = vsub.f32 %v386_v60, %v412_v62 }
   0xc   :  { %v62_v12 = vand.u32 4294901760, %v61_v10  ;;  %v244_v24 = vsub.f32 %v242_v17, %v243_v20  ;;  %v250_v29 = vsub.f32 %v248_v21, %v249_v25  ;;  %v439_v63 = vand.u32 4294901760, %v438_v61 }
   0xd   :  { %87 = vmatpush.msra.mxu1 %v86_v13  ;;  %217 = vmatpush.msrb.mxu2 %v216_v22  ;;  %v256_v33 = vsub.f32 %v254_v26, %v255_v30  ;;  %v262_v36 = vsub.f32 %v260_v31, %v261_v34  ;;  %v445_v2 = vand.u32 4294901760, %v444_v0  ;;  %vm555_vm4 = vcmask 64512  }
   0xe   :  { %63 = vmatmul.f32.vlgmr.msra.gmra.mxu0 %v62_v12  ;;  %89 = vmatmul.f32.vlgmr.msra.gmra.mxu1 %v58_v5  ;;  %v245_v28 = vand.u32 4294901760, %v244_v24  ;;  %v251_v32 = vand.u32 4294901760, %v250_v29  ;;  %v440_v1 = vsub.f32 %v438_v61, %v439_v63 }
   0xf   :  { %181 = vmatpush.msrb.mxu1 %v56_v4  ;;  %284 = vmatpush.msra.mxu0 %v242_v17  ;;  %v257_v35 = vand.u32 4294901760, %v256_v33  ;;  %v263_v37 = vand.u32 4294901760, %v262_v36  ;;  %v446_v4 = vsub.f32 %v444_v0, %v445_v2 }
  0x10   :  { %219 = vmatpush.msrb.mxu2 %v218_v27  ;;  %246 = vmatpush.msrb.mxu3 %v245_v28  ;;  %v441_v3 = vand.u32 4294901760, %v440_v1 }
  0x11   :  { %313 = vmatpush.msra.mxu1 %v212_v15  ;;  %287 = vmatpush.msra.mxu0 %v248_v21 }
  0x12   :  { %342 = vmatpush.msra.mxu2 %v243_v20  ;;  %252 = vmatpush.msrb.mxu3 %v251_v32 }
  0x13   :  { %315 = vmatpush.msra.mxu1 %v214_v18  ;;  %290 = vmatpush.msra.mxu0 %v254_v26  ;;  %v576_v26 = vld [vmem:[%s686_s6] ss:$0 sm:$0xff] }
  0x14   :  { %346 = vmatpush.msra.mxu2 %v249_v25  ;;  %258 = vmatpush.msrb.mxu3 %v257_v35 }
  0x15   :  { %317 = vmatpush.msra.mxu1 %v216_v22  ;;  %293 = vmatpush.msra.mxu0 %v260_v31 }
  0x16   :  { %161 = vmatmul.f32.vlgmr.msrb.gmra.mxu0 %v58_v5  ;;  %183 = vmatmul.f32.vlgmr.msrb.gmra.mxu1 %v58_v5  ;;  %v447_v5 = vand.u32 4294901760, %v446_v4 }
  0x17   :  { %319 = vmatpush.msra.mxu1 %v218_v27  ;;  %350 = vmatpush.msra.mxu2 %v255_v30 }
  0x18   :  { %264 = vmatpush.msrb.mxu3 %v263_v37  ;;  %411 = vmatpush.msrb.mxu0 %v410_v59 }
  0x19   :  { %354 = vmatpush.msra.mxu2 %v261_v34  ;;  %442 = vmatpush.msrb.mxu1 %v441_v3 }
  0x1a   :  { %373 = vmatpush.msra.mxu3 %v212_v15  ;;  %413 = vmatpush.msrb.mxu0 %v412_v62 }
  0x1b   :  { %448 = vmatpush.msrb.mxu1 %v447_v5 }
  0x1c   :  { %375 = vmatpush.msra.mxu3 %v214_v18 }
  0x1e   :  { %377 = vmatpush.msra.mxu3 %v216_v22 }
  0x20   :  { %379 = vmatpush.msra.mxu3 %v218_v27 }
  0x8b   :  { %v64_v39 = vpop.f32.mrf.mxu0  ;;  %v90_v41 = vpop.f32.mrf.mxu1 }
  0x8c   :  { %v65_v40 = vadd.f32 %v574_v38, %v64_v39  ;;  %v114_v42 = vpop.f32.mrf.mxu2 }
  0x8d   :  { %v138_v44 = vpop.f32.mrf.mxu3 }
  0x8e   :  { %v91_v43 = vadd.f32 %v90_v41, %v65_v40 }
  0x90   :  { %v115_v45 = vadd.f32 %v114_v42, %v91_v43 }
  0x92   :  { %v139_v46 = vadd.f32 %v138_v44, %v115_v45 }
  0x93   :  { %v162_v47 = vpop.f32.mrf.mxu0  ;;  %v184_v49 = vpop.f32.mrf.mxu1 }
  0x94   :  { %v163_v48 = vadd.f32 %v162_v47, %v139_v46 }
  0x96   :  { %v185_v50 = vadd.f32 %v184_v49, %v163_v48 }
  0x98   :  { %v187_v51 = vmax.f32 %v185_v50, 0.0 }
  0x9a   :  { %v198_v52 = vsel %vm196_vm2, %v187_v51, 0 }
  0x9b   :  { %v220_v53 = vand.u32 4294901760, %v198_v52 }
  0x9d   :  { %v221_v54 = vsub.f32 %v198_v52, %v220_v53  ;;  %266 = vmatmul.f32.vlgmr.msrb.gmra.mxu3 %v220_v53 }
  0x9e   :  { %495 = vmatpush.msrb.mxu3 %v410_v59 }
  0x9f   :  { %296 = vmatmul.f32.vlgmr.msra.gmra.mxu0 %v221_v54  ;;  %v222_v55 = vand.u32 4294901760, %v221_v54 }
  0xa0   :  { %497 = vmatpush.msrb.mxu3 %v412_v62  ;;  %522 = vmatpush.msra.mxu0 %v439_v63 }
  0xa1   :  { %323 = vmatmul.f32.vlgmr.msra.gmra.mxu1 %v222_v55  ;;  %v223_v56 = vsub.f32 %v221_v54, %v222_v55 }
  0xa2   :  { %526 = vmatpush.msra.mxu0 %v445_v2  ;;  %547 = vmatpush.msra.mxu1 %v410_v59 }
  0xa3   :  { %v224_v57 = vand.u32 4294901760, %v223_v56 }
  0xa4   :  { %549 = vmatpush.msra.mxu1 %v412_v62 }
  0xa5   :  { %225 = vmatmul.f32.vlgmr.msrb.gmra.mxu2 %v224_v57  ;;  %381 = vmatmul.f32.vlgmr.msra.gmra.mxu3 %v220_v53 }
  0xa6   :  { %470 = vmatpush.msrb.mxu2 %v438_v61 }
  0xa8   :  { %473 = vmatpush.msrb.mxu2 %v444_v0 }
  0xad   :  { %356 = vmatmul.f32.vlgmr.msra.gmra.mxu2 %v220_v53 }
 0x11c   :  { %v297_v11 = vpop.f32.mrf.mxu0 }
 0x11e   :  { %v324_v13 = vpop.f32.mrf.mxu1 }
 0x120   :  { %v267_v7 = vpop.f32.mrf.mxu3 }
 0x128   :  { %v226_v8 = vpop.f32.mrf.mxu2  ;;  %v382_v17 = vpop.f32.mrf.mxu3 }
 0x129   :  { %v227_v9 = vadd.f32 %v575_v6, %v226_v8 }
 0x12b   :  { %v268_v10 = vadd.f32 %v267_v7, %v227_v9 }
 0x12d   :  { %v298_v12 = vadd.f32 %v297_v11, %v268_v10 }
 0x12f   :  { %v325_v14 = vadd.f32 %v324_v13, %v298_v12 }
 0x130   :  { %v357_v15 = vpop.f32.mrf.mxu2 }
 0x131   :  { %v358_v16 = vadd.f32 %v357_v15, %v325_v14 }
 0x133   :  { %v383_v18 = vadd.f32 %v382_v17, %v358_v16 }
 0x135   :  { %v385_v19 = vmax.f32 %v383_v18, 0.0 }
 0x137   :  { %v394_v20 = vsel %vm392_vm3, %v385_v19, 0 }
 0x138   :  { %v414_v21 = vand.u32 4294901760, %v394_v20 }
 0x13a   :  { %v415_v22 = vsub.f32 %v394_v20, %v414_v21  ;;  %450 = vmatmul.f32.vlgmr.msrb.gmra.mxu1 %v414_v21 }
 0x13c   :  { %476 = vmatmul.f32.vlgmr.msrb.gmra.mxu2 %v415_v22  ;;  %v416_v23 = vand.u32 4294901760, %v415_v22 }
 0x13e   :  { %501 = vmatmul.f32.vlgmr.msrb.gmra.mxu3 %v416_v23  ;;  %v417_v24 = vsub.f32 %v415_v22, %v416_v23 }
 0x140   :  { %v418_v25 = vand.u32 4294901760, %v417_v24 }
 0x142   :  { %419 = vmatmul.f32.vlgmr.msrb.gmra.mxu0 %v418_v25  ;;  %551 = vmatmul.f32.vlgmr.msra.gmra.mxu1 %v414_v21 }
 0x14a   :  { %528 = vmatmul.f32.vlgmr.msra.gmra.mxu0 %v414_v21 }
 0x1b7   :  { %v451_v27 = vpop.f32.mrf.mxu1 }
 0x1bf   :  { %v420_v28 = vpop.f32.mrf.mxu0  ;;  %v477_v31 = vpop.f32.mrf.mxu2 }
 0x1c0   :  { %v421_v29 = vadd.f32 %v576_v26, %v420_v28  ;;  %v552_v37 = vpop.f32.mrf.mxu1 }
 0x1c1   :  { %v502_v33 = vpop.f32.mrf.mxu3 }
 0x1c2   :  { %v452_v30 = vadd.f32 %v451_v27, %v421_v29 }
 0x1c4   :  { %v478_v32 = vadd.f32 %v477_v31, %v452_v30 }
 0x1c6   :  { %v503_v34 = vadd.f32 %v502_v33, %v478_v32 }
 0x1c7   :  { %v529_v35 = vpop.f32.mrf.mxu0 }
 0x1c8   :  { %v530_v36 = vadd.f32 %v529_v35, %v503_v34 }
 0x1ca   :  { %v553_v38 = vadd.f32 %v552_v37, %v530_v36 }
 0x1cc   :  { %556 = vst.msk [vmem:[#allocation2] sm:$0xff] %vm555_vm4, %v553_v38 }
 0x1cd   :  { %567 = dma.vmem_to_hbm [thread:$0]  %s563_s18, 128, %s565_s21, [#allocation3]  }
 0x1ce   :  { %601 = dma.done.wait [#allocation3], 128  }
 0x1cf   :  { %602 = vsyncadd [#allocation3], 4294967168 }
 0x1d0   :  { %572 = vsyncpa [#allocation3], 1 }

</bundles_post_ra>
